<compile_context>
chip_gen: v7x
topology: tpu7x:2x2x1
jax: 0.10.0
libtpu: 0.0.40
codegen_flags: <defaults>
</compile_context>

<pallas_src>
import numpy as np
import jax
import jax.numpy as jnp
from jax import lax
from jax.experimental import pallas as pl
from jax.experimental.pallas import tpu as pltpu


def get_P(H, k):
    """NumPy re-implementation of getP (DCT sub-basis projection matrix)."""
    ind = np.array([2 * x + 1 for x in range(H)], dtype=np.float64)
    Dt = np.stack(
        [np.sqrt(2.0) / np.sqrt(H) * np.cos(u * ind * np.pi / (2.0 * H)) for u in range(H)]
    ).astype(np.float32)
    Dt[0, :] = 1.0 / np.sqrt(H)
    D = Dt.T.copy()                       # (H, H)
    Dh = D[:, k[0]:k[1]]                  # (H, kh)
    Dv = D[:, k[2]:k[3]]                  # (H, kv)
    EH = np.eye(H * H, dtype=np.float32).reshape(H * H, H, H)
    P = np.matmul(EH, Dh)                 # (H*H, H, kh)
    P = np.transpose(P, (0, 2, 1))        # (H*H, kh, H)
    P = np.matmul(P, Dv)                  # (H*H, kh, kv)
    P = np.transpose(P, (0, 2, 1))        # (H*H, kv, kh)
    P = P.reshape(H * H, (k[1] - k[0]) * (k[3] - k[2]))
    return P.astype(np.float32)


def _dctnl_kernel(x_ref, p_ref, pt_ref, a_ref, wv_ref, bias_ref, o_ref):
    """One batch per grid step (leading batch dim squeezed -> pure 2-D math).

    Per batch b:  out_b = Wv @ (xp_b xp_b^T) @ A @ xp_b,  A = gamma*Wk^T Wq/(H*W)
    which is the reference  WvxP @ (WkxP^T WqxP / HW)  reassociated.
    """
    f32 = jnp.float32
    x = x_ref[...]                                                    # (C, HW) f32

    # Big projection #1: DCT coefficients.  bf16 MXU inputs, f32 accumulation.
    xp = jnp.dot(x.astype(jnp.bfloat16), p_ref[...],
                 preferred_element_type=f32)                          # (C, Lp)

    # Per-batch Gram matrix via an N-T contraction (no transpose materialized).
    gram = lax.dot_general(xp, xp, (((1,), (1,)), ((), ())),
                           preferred_element_type=f32)                # (C, C)

    # Middle stage kept in f32 (A already contains gamma and the 1/(H*W) scale).
    axp = jnp.dot(a_ref[...], xp, preferred_element_type=f32)         # (C, Lp)
    t = jnp.dot(gram, axp, preferred_element_type=f32)                # (C, Lp)
    v = jnp.dot(wv_ref[...], t, preferred_element_type=f32)           # (C, Lp)

    # Big projection #2: back to the spatial domain (pre-transposed P, bf16).
    proj = jnp.dot(v.astype(jnp.bfloat16), pt_ref[...],
                   preferred_element_type=f32)                        # (C, HW)

    # gamma*(proj + bias) + x, with gamma already folded into A and bias.
    o_ref[...] = proj + bias_ref[...] + x


def _vmem_limit_bytes(est_bytes):
    """Generation-aware scoped-VMEM limit (v5e/v6e 128 MiB, v7x 64 MiB physical)."""
    cap = 64 * 1024 * 1024
    try:
        info = pltpu.get_tpu_info()
        cap = int(getattr(info, "vmem_capacity_bytes", cap))
    except Exception:
        pass
    want = max(32 * 1024 * 1024, 2 * est_bytes + (8 << 20))
    return int(min(want, int(cap * 0.75)))


def dctnl_attention21(x, P, wq, wk, wv, out_bias, gamma):
    """x: (B, C, H, W) float32.  Returns (B, C, H, W) float32."""
    B, C, H, W = x.shape
    HW = H * W
    L = P.shape[1]
    assert P.shape[0] == HW

    f32 = jnp.float32
    bf16 = jnp.bfloat16

    # Pad the DCT-coefficient axis to a lane-dense multiple of 128 (pure layout
    # win: all (C, Lp) intermediates use full vregs; the extra columns are zero
    # so the math is unchanged).
    Lp = ((L + 127) // 128) * 128
    P32 = P.astype(f32)
    if Lp != L:
        P32 = jnp.pad(P32, ((0, 0), (0, Lp - L)))
    P_b = P32.astype(bf16)                                 # (HW, Lp)  bf16
    Pt_b = jnp.transpose(P32).astype(bf16)                 # (Lp, HW)  bf16, wrapper-side

    gamma_s = jnp.asarray(gamma, f32).reshape(())
    # Fold query/key convs, the 1/(H*W) scale and gamma into one (C, C) matrix.
    A = (gamma_s / float(HW)) * jnp.dot(wk.astype(f32).T, wq.astype(f32))   # (C, C)
    Wv = wv.astype(f32)                                                     # (C, C)
    bias_g = gamma_s * out_bias.reshape(C, 1).astype(f32)                   # (C, 1)

    # Contiguous NCHW -> (B, C, HW): free metadata reshape outside the kernel.
    x3 = x.reshape(B, C, HW).astype(f32)

    # Per-step VMEM estimate: double-buffered x/out blocks (f32) + the
    # double-buffered grid-invariant operands (bf16 P/Pt + small f32 mats).
    est = (2 * 2 * C * HW * 4                     # x + out blocks, 2 buffers each
           + 2 * (2 * HW * Lp * 2                 # P + P^T (bf16), 2 buffers each
                  + 2 * C * C * 4 + C * 4))       # A, Wv, bias

    out3 = pl.pallas_call(
        _dctnl_kernel,
        out_shape=jax.ShapeDtypeStruct((B, C, HW), f32),
        grid=(B,),
        in_specs=[
            pl.BlockSpec((None, C, HW), lambda b: (b, 0, 0)),   # x, one batch/step
            pl.BlockSpec((HW, Lp), lambda b: (0, 0)),           # P   (bf16)
            pl.BlockSpec((Lp, HW), lambda b: (0, 0)),           # P^T (bf16)
            pl.BlockSpec((C, C), lambda b: (0, 0)),             # A = gamma*Wk^T Wq/(HW)
            pl.BlockSpec((C, C), lambda b: (0, 0)),             # Wv
            pl.BlockSpec((C, 1), lambda b: (0, 0)),             # gamma * bias
        ],
        out_specs=pl.BlockSpec((None, C, HW), lambda b: (b, 0, 0)),
        compiler_params=pltpu.CompilerParams(
            dimension_semantics=("parallel",),
            vmem_limit_bytes=_vmem_limit_bytes(est),
        ),
    )(x3, P_b, Pt_b, A, Wv, bias_g)

    return out3.reshape(B, C, H, W)


def _reference(x, P, wq, wk, wv, out_bias, gamma):
    """Direct (unfused) re-implementation of the PyTorch forward pass."""
    B, C, H, W = x.shape
    HW = H * W
    xP = jnp.einsum("bcn,nl->bcl", x.reshape(B, C, HW), P)
    q = jnp.einsum("dc,bcl->bdl", wq, xP)
    k = jnp.einsum("dc,bcl->bdl", wk, xP)
    v = jnp.einsum("dc,bcl->bdl", wv, xP)
    fatt = jnp.einsum("bdl,bdm->blm", k, q) / HW
    out = jnp.einsum("bcl,blm->bcm", v, fatt)
    out = jnp.einsum("bcm,nm->bcn", out, P)
    out = out + out_bias.reshape(1, C, 1)
    return gamma.reshape(()) * out.reshape(B, C, H, W) + x


if __name__ == "__main__":
    # Small shapes consistent with the module: NCHW input, square spatial.
    B, C, H, W = 2, 4, 16, 16
    k = (0, 8, 0, 8)                      # keep an 8x8 block of DCT coeffs
    out_dim = max(C // 8, 2)

    key = jax.random.PRNGKey(0)
    kx, kq, kk_, kv, kb = jax.random.split(key, 5)

    x = jax.random.normal(kx, (B, C, H, W), dtype=jnp.float32)

    # Conv1d weights with kernel_size=1 have shape (out, in); bias (1, C, 1);
    # gamma scalar set nonzero so the attention branch contributes.
    wq = 0.1 * jax.random.normal(kq, (out_dim, C), dtype=jnp.float32)
    wk = 0.1 * jax.random.normal(kk_, (out_dim, C), dtype=jnp.float32)
    wv = 0.1 * jax.random.normal(kv, (C, C), dtype=jnp.float32)
    out_bias = 0.1 * jax.random.normal(kb, (1, C, 1), dtype=jnp.float32)
    gamma = jnp.array([0.5], dtype=jnp.float32)

    P = jnp.asarray(get_P(H, k))          # (H*W, (k1-k0)*(k3-k2)) = (256, 64)

    out = dctnl_attention21(x, P, wq, wk, wv, out_bias, gamma)
    out = jax.block_until_ready(out)

    ref = _reference(x, P, wq, wk, wv, out_bias, gamma)
    assert out.shape == (B, C, H, W)
    # Tolerance relaxed vs f32-only (the two big projections use bf16 MXU inputs).
    assert jnp.allclose(out, ref, atol=2e-2, rtol=2e-2), "mismatch vs reference"

    print("KERNEL_OK")
</pallas_src>

<mosaic_0001>
module attributes {stable_mosaic.version = 11 : i64} {
  func.func @_dctnl_kernel(%arg0: i32, %arg1: memref<1x4x256xf32, #tpu.memory_space<vmem>>, %arg2: memref<256x128xbf16, #tpu.memory_space<vmem>>, %arg3: memref<128x256xbf16, #tpu.memory_space<vmem>>, %arg4: memref<4x4xf32, #tpu.memory_space<vmem>>, %arg5: memref<4x4xf32, #tpu.memory_space<vmem>>, %arg6: memref<4x1xf32, #tpu.memory_space<vmem>>, %arg7: memref<1x4x256xf32, #tpu.memory_space<vmem>>) attributes {dimension_semantics = [#tpu.dimension_semantics<parallel>], iteration_bounds = array<i64: 2>, scalar_prefetch = 0 : i64, scratch_operands = 0 : i64, tpu.core_type = #tpu.core_type<tc>, window_params = [{transform_indices = @transform_0, window_bounds = array<i64: 1, 4, 256>}, {pipeline_mode = #tpu.pipeline_mode<synchronous>, transform_indices = @transform_1, window_bounds = array<i64: 256, 128>}, {pipeline_mode = #tpu.pipeline_mode<synchronous>, transform_indices = @transform_2, window_bounds = array<i64: 128, 256>}, {pipeline_mode = #tpu.pipeline_mode<synchronous>, transform_indices = @transform_3, window_bounds = array<i64: 4, 4>}, {pipeline_mode = #tpu.pipeline_mode<synchronous>, transform_indices = @transform_4, window_bounds = array<i64: 4, 4>}, {pipeline_mode = #tpu.pipeline_mode<synchronous>, transform_indices = @transform_5, window_bounds = array<i64: 4, 1>}, {transform_indices = @transform_6, window_bounds = array<i64: 1, 4, 256>}]} {
    %c0 = arith.constant 0 : index
    %c0_0 = arith.constant 0 : index
    %c0_1 = arith.constant 0 : index
    %0 = vector.load %arg1[%c0, %c0_0, %c0_1] : memref<1x4x256xf32, #tpu.memory_space<vmem>>, vector<1x4x256xf32>
    %1 = vector.shape_cast %0 : vector<1x4x256xf32> to vector<4x256xf32>
    %2 = arith.truncf %1 : vector<4x256xf32> to vector<4x256xbf16>
    %c0_2 = arith.constant 0 : index
    %c0_3 = arith.constant 0 : index
    %3 = vector.load %arg2[%c0_2, %c0_3] : memref<256x128xbf16, #tpu.memory_space<vmem>>, vector<256x128xbf16>
    %cst = arith.constant dense<0.000000e+00> : vector<4x128xf32>
    %4 = tpu.matmul %2, %3, %cst {dimension_numbers = #tpu.dot_dimension_numbers<[1], [0], [0], [1], [0, 0, 1, 1], [], []>} : vector<4x256xbf16>, vector<256x128xbf16>, vector<4x128xf32> -> vector<4x128xf32>
    %cst_4 = arith.constant dense<0.000000e+00> : vector<4x4xf32>
    %5 = tpu.matmul %4, %4, %cst_4 {dimension_numbers = #tpu.dot_dimension_numbers<[1], [1], [0], [0], [0, 0, 1, 0], [], []>} : vector<4x128xf32>, vector<4x128xf32>, vector<4x4xf32> -> vector<4x4xf32>
    %c0_5 = arith.constant 0 : index
    %c0_6 = arith.constant 0 : index
    %6 = vector.load %arg4[%c0_5, %c0_6] : memref<4x4xf32, #tpu.memory_space<vmem>>, vector<4x4xf32>
    %cst_7 = arith.constant dense<0.000000e+00> : vector<4x128xf32>
    %7 = tpu.matmul %6, %4, %cst_7 {dimension_numbers = #tpu.dot_dimension_numbers<[1], [0], [0], [1], [0, 0, 1, 1], [], []>} : vector<4x4xf32>, vector<4x128xf32>, vector<4x128xf32> -> vector<4x128xf32>
    %cst_8 = arith.constant dense<0.000000e+00> : vector<4x128xf32>
    %8 = tpu.matmul %5, %7, %cst_8 {dimension_numbers = #tpu.dot_dimension_numbers<[1], [0], [0], [1], [0, 0, 1, 1], [], []>} : vector<4x4xf32>, vector<4x128xf32>, vector<4x128xf32> -> vector<4x128xf32>
    %c0_9 = arith.constant 0 : index
    %c0_10 = arith.constant 0 : index
    %9 = vector.load %arg5[%c0_9, %c0_10] : memref<4x4xf32, #tpu.memory_space<vmem>>, vector<4x4xf32>
    %cst_11 = arith.constant dense<0.000000e+00> : vector<4x128xf32>
    %10 = tpu.matmul %9, %8, %cst_11 {dimension_numbers = #tpu.dot_dimension_numbers<[1], [0], [0], [1], [0, 0, 1, 1], [], []>} : vector<4x4xf32>, vector<4x128xf32>, vector<4x128xf32> -> vector<4x128xf32>
    %11 = arith.truncf %10 : vector<4x128xf32> to vector<4x128xbf16>
    %c0_12 = arith.constant 0 : index
    %c0_13 = arith.constant 0 : index
    %12 = vector.load %arg3[%c0_12, %c0_13] : memref<128x256xbf16, #tpu.memory_space<vmem>>, vector<128x256xbf16>
    %cst_14 = arith.constant dense<0.000000e+00> : vector<4x256xf32>
    %13 = tpu.matmul %11, %12, %cst_14 {dimension_numbers = #tpu.dot_dimension_numbers<[1], [0], [0], [1], [0, 0, 1, 1], [], []>} : vector<4x128xbf16>, vector<128x256xbf16>, vector<4x256xf32> -> vector<4x256xf32>
    %c0_15 = arith.constant 0 : index
    %c0_16 = arith.constant 0 : index
    %14 = vector.load %arg6[%c0_15, %c0_16] : memref<4x1xf32, #tpu.memory_space<vmem>>, vector<4x1xf32>
    %15 = vector.broadcast %14 : vector<4x1xf32> to vector<4x256xf32>
    %16 = arith.addf %13, %15 : vector<4x256xf32>
    %17 = arith.addf %16, %1 : vector<4x256xf32>
    %c0_17 = arith.constant 0 : index
    %c0_18 = arith.constant 0 : index
    %c0_19 = arith.constant 0 : index
    %18 = vector.load %arg7[%c0_17, %c0_18, %c0_19] : memref<1x4x256xf32, #tpu.memory_space<vmem>>, vector<1x4x256xf32>
    %19 = vector.shape_cast %18 : vector<1x4x256xf32> to vector<4x256xf32>
    %20 = vector.shape_cast %17 : vector<4x256xf32> to vector<1x4x256xf32>
    tpu.vector_store %arg7[%c0_17, %c0_18, %c0_19], %20 {strides = array<i32>} : memref<1x4x256xf32, #tpu.memory_space<vmem>>, vector<1x4x256xf32>,
    return
  }
  func.func @transform_0(%arg0: i32) -> (i32, i32, i32) {
    %c0_i32 = arith.constant 0 : i32
    %c0_i32_0 = arith.constant 0 : i32
    %c0_i32_1 = arith.constant 0 : i32
    return %arg0, %c0_i32, %c0_i32_0 : i32, i32, i32
  }
  func.func @transform_1(%arg0: i32) -> (i32, i32) {
    %c0_i32 = arith.constant 0 : i32
    %c0_i32_0 = arith.constant 0 : i32
    %c0_i32_1 = arith.constant 0 : i32
    return %c0_i32, %c0_i32_0 : i32, i32
  }
  func.func @transform_2(%arg0: i32) -> (i32, i32) {
    %c0_i32 = arith.constant 0 : i32
    %c0_i32_0 = arith.constant 0 : i32
    %c0_i32_1 = arith.constant 0 : i32
    return %c0_i32, %c0_i32_0 : i32, i32
  }
  func.func @transform_3(%arg0: i32) -> (i32, i32) {
    %c0_i32 = arith.constant 0 : i32
    %c0_i32_0 = arith.constant 0 : i32
    %c0_i32_1 = arith.constant 0 : i32
    return %c0_i32, %c0_i32_0 : i32, i32
  }
  func.func @transform_4(%arg0: i32) -> (i32, i32) {
    %c0_i32 = arith.constant 0 : i32
    %c0_i32_0 = arith.constant 0 : i32
    %c0_i32_1 = arith.constant 0 : i32
    return %c0_i32, %c0_i32_0 : i32, i32
  }
  func.func @transform_5(%arg0: i32) -> (i32, i32) {
    %c0_i32 = arith.constant 0 : i32
    %c0_i32_0 = arith.constant 0 : i32
    %c0_i32_1 = arith.constant 0 : i32
    return %c0_i32, %c0_i32_0 : i32, i32
  }
  func.func @transform_6(%arg0: i32) -> (i32, i32, i32) {
    %c0_i32 = arith.constant 0 : i32
    %c0_i32_0 = arith.constant 0 : i32
    %c0_i32_1 = arith.constant 0 : i32
    return %arg0, %c0_i32, %c0_i32_0 : i32, i32, i32
  }
}

</mosaic_0001>

<bundles_post_ra>
// kernel: tpu_custom_call.1
= control target key start
LH: loop header
LB: loop body
LE: loop exit
PB: predicated region body
PF: predicated region fallthrough
CT: control target
= control target key end

     0   :  { %11 = vsyncpa [#allocation3], 0  ;;  %s1721_s0 = inlined_call_operand.hbm [shape: f32[2,4,256], index: 0, kind: input, shape index: {}]   ;;  %s1722_s1 = inlined_call_operand.hbm [shape: bf16[256,128], index: 1, kind: input, shape index: {}]   ;;  %s1723_s2 = inlined_call_operand.hbm [shape: bf16[128,256], index: 2, kind: input, shape index: {}]   ;;  %s1724_s3 = inlined_call_operand.vmem [shape: f32[4,4], index: 3, kind: input, shape index: {}]   ;;  %s1725_s4 = inlined_call_operand.vmem [shape: f32[4,4], index: 4, kind: input, shape index: {}]   ;;  %s1726_s5 = inlined_call_operand.vmem [shape: f32[4,1], index: 5, kind: input, shape index: {}]   ;;  %s1727_s6 = inlined_call_operand.hbm [shape: f32[2,4,256], index: 6, kind: output, shape index: {}]  }
   0x1   :  { %13 = vsyncpa [#allocation3 + $0x1], 0 }
   0x2   :  { %14 = vsyncpa [#allocation6], 0 }
   0x3   :  { %15 = vsyncpa [#allocation4], 0 }
   0x4   :  { %17 = vsyncpa [#allocation4 + $0x1], 0  ;;  %s1457_s21 = smov 0   ;;  %s1459_s22 = smov 0  }
   0x5   :  { %s1461_s23 = smov 0   ;;  %s1463_s24 = smov 0  }
   0x6 LB: > { %s1478_s25 = sadd.s32 4294967295, %s1409_s24   ;;  %s1029_s26 = sadd.s32 4294967294, %s1409_s24   ;;  %s1409_s24 = sphi %s1463_s24, %s1747_s24   ;;  %s1405_s23 = sphi %s1461_s23, %s1746_s23   ;;  %s1401_s22 = sphi %s1459_s22, %s1745_s22   ;;  %s1397_s21 = sphi %s1457_s21, %s1744_s21  }
   0x7   : > { %p43_p0 = scmp.ne.s32.totalorder %s1401_s22, %s1397_s21  ;;  %p1728_p1 = scmp.eq.s32.totalorder %s1478_s25, 0 }
   0x8   : > { %p178_p3 = scmp.eq.s32.totalorder %s1029_s26, 1  ;;  %p1030_p5 = scmp.ge.s32.totalorder %s1409_s24, 1 }
   0x9   : > { %p1487_p4 = por %p1728_p1, %p43_p0  ;;  %p185_p7 = scmp.lt.s32.totalorder %s1409_s24, 3 }
   0xa   : > { %p1492_p6 = por %p178_p3, %p43_p0  ;;  %s1411_s30 = smov [#allocation5]  }
   0xb   : > { %s1731_s27 = scalar_select %p1487_p4, 1, 0 }
   0xc   : > { %s1732_s28 = scalar_select %p1492_p6, 1, 0 }
   0xd   : > { %p1497_p8 = pnand %p1030_p5, %p185_p7  ;;  %s197_s7 = sshll.u32 %s1411_s30, 4  ;;  %s1501_s7 = int_to_ptr.vmem [resolvable:$true] %s197_s7 }
   0xe   : > { %s1412_s9 = smov [#allocation7]   ;;  %s1253_s13 = scalar_lea.hbm %s1722_s1, 2048 }
   0xf   : > { %p1149_p9 = pneg %p1497_p8  ;;  %s210_s10 = sshll.u32 %s1412_s9, 4  ;;  %s1512_s10 = int_to_ptr.vmem [resolvable:$true] %s210_s10 }
  0x10   : > { %p1254_p12 = scmp.ne.s32.totalorder %s1722_s1, %s1253_s13  ;;  %p1260_p5 = scmp.lt.u32.totalorder %s1253_s13, %s1722_s1 }
  0x11   : > { %p1508_p11 = pnand %p1149_p9, %p1728_p1 }
  0x13   : > { %p1255_p13 = pneg %p1508_p11 }
  0x15   : > { %p1256_p0 = pnand %p1255_p13, %p1254_p12 }
  0x17   : > { %p1257_p3 = pneg %p1256_p0 }
  0x19   : > { %p1262_p7 = pnand %p1260_p5, %p1257_p3 }
  0x1b   : > { %1265 = shalt.err (!%p1262_p7)
}
  0x1c   : > { %s1266_s18 = scalar_lea.vmem %s1501_s7, 2048  ;;  %p1274_p2 = scmp.lt.s32.totalorder %s1501_s7, %s1501_s7 }
  0x1d   : > { %p1267_p9 = scmp.ne.s32.totalorder %s1501_s7, %s1266_s18  ;;  %p1275_p12 = scmp.lt.s32.totalorder %s1266_s18, %s1266_s18 }
  0x1f   : > { %p1269_p10 = pnand %p1267_p9, %p1255_p13  ;;  %p1276_p0 = por %p1275_p12, %p1274_p2 }
  0x21   : > { %p1270_p1 = pneg %p1269_p10 }
  0x23   : > { %p1277_p6 = pnand %p1276_p0, %p1270_p1 }
  0x25   : > { %1280 = shalt.err (!%p1277_p6)
}
  0x26   : > { %s1413_s19 = smov 64   ;;  %s1414_s20 = smov 4  }
  0x27   : > { %1152 = dma.hbm_to_vmem [thread:$0]  (!%p1508_p11), %s1722_s1, 2048, %s1501_s7, [#allocation6], %s1413_s19, %s1413_s19, %s1414_s20  }
  0x28   : > { %s1281_s12 = scalar_lea.hbm %s1723_s2, 2048 }
  0x29   : > { %p1282_p2 = scmp.ne.s32.totalorder %s1723_s2, %s1281_s12  ;;  %p1288_p10 = scmp.lt.u32.totalorder %s1281_s12, %s1723_s2 }
  0x2b   : > { %p1284_p1 = pnand %p1282_p2, %p1255_p13 }
  0x2d   : > { %p1285_p6 = pneg %p1284_p1 }
  0x2f   : > { %p1290_p3 = pnand %p1288_p10, %p1285_p6 }
  0x31   : > { %1293 = shalt.err (!%p1290_p3)
}
  0x32   : > { %s1294_s7 = scalar_lea.vmem %s1512_s10, 2048  ;;  %p1302_p12 = scmp.lt.s32.totalorder %s1512_s10, %s1512_s10 }
  0x33   : > { %p1295_p5 = scmp.ne.s32.totalorder %s1512_s10, %s1294_s7  ;;  %p1303_p0 = scmp.lt.s32.totalorder %s1294_s7, %s1294_s7 }
  0x35   : > { %p1297_p7 = pnand %p1295_p5, %p1255_p13  ;;  %p1304_p2 = por %p1303_p0, %p1302_p12 }
  0x37   : > { %p1298_p9 = pneg %p1297_p7 }
  0x39   : > { %p1305_p1 = pnand %p1304_p2, %p1298_p9 }
  0x3b   : > { %1308 = shalt.err (!%p1305_p1)
}
  0x3c   : > { %s1415_s17 = smov 128   ;;  %s1416_s18 = smov 8  }
  0x3d   : > { %1155 = dma.hbm_to_vmem [thread:$0]  (!%p1508_p11), %s1723_s2, 2048, %s1512_s10, [#allocation6], %s1415_s17, %s1415_s17, %s1416_s18  }
  0x3e   : > { %s1567_s26 = sadd.s32 1, %s1409_s24   ;;  %s30_s9 = sadd.s32 1, %s1405_s23 }
  0x3f   : > { %s27_s30 = ssub.s32 %s1409_s24, %s1567_s26  ;;  %p37_p6 = scmp.ne.s32.totalorder %s1405_s23, %s1401_s22 }
  0x40   : > { %p28_p13 = scmp.eq.s32.totalorder %s27_s30, 0  ;;  %p38_p10 = scmp.eq.s32.totalorder %s1409_s24, 0 }
  0x41   : > { %p1735_p5 = scmp.eq.s32.totalorder %s1478_s25, 1  ;;  %p1166_p9 = scmp.lt.s32.totalorder %s1409_s24, 2 }
  0x42   : > { %s1576_s11 = scalar_select %p28_p13, %s1405_s23, %s30_s9  }
  0x43   : > { %p39_p3 = por %p38_p10, %p37_p6  ;;  %p1580_p7 = por %p1735_p5, %p37_p6 }
  0x44   : > { %s233_s8 = sand.u32 1, %s1405_s23   ;;  %s1085_s10 = sshll.u32 %s1409_s24, 7 }
  0x45   : > { %s1736_s12 = scalar_select %p1580_p7, 1, 0 }
  0x46   : > { %s1034_s13 = sshll.u32 %s233_s8, 3  ;;  %s1590_s16 = scalar_lea.hbm %s1721_s0, %s1085_s10 }
  0x47   : > { %s237_s7 = scalar_lea.vmem [#allocation2], %s1034_s13  ;;  %p1594_p11 = pnand %p1166_p9, %p39_p3 }
  0x48   : > { %s245_s17 = sshll.u32 %s237_s7, 4  ;;  %s234_s19 = scalar_lea.sflag [#allocation3], %s233_s8  ;;  %s1592_s17 = int_to_ptr.vmem [resolvable:$true] %s245_s17 }
  0x49   : > { %s1309_s20 = scalar_lea.hbm %s1590_s16, 128  ;;  %p1311_p0 = pneg %p1594_p11 }
  0x4a   : > { %p1310_p12 = scmp.ne.s32.totalorder %s1590_s16, %s1309_s20  ;;  %s1314_s13 = scalar_lea.hbm %s1721_s0, 256 }
  0x4b   : > { %p1315_p13 = scmp.lt.u32.totalorder %s1590_s16, %s1721_s0  ;;  %p1316_p6 = scmp.lt.u32.totalorder %s1314_s13, %s1309_s20 }
  0x4c   : > { %p1312_p2 = pnand %p1311_p0, %p1310_p12  ;;  %p1318_p3 = scmp.lt.u32.totalorder %s1309_s20, %s1590_s16 }
  0x4d   : > { %p1317_p10 = por %p1316_p6, %p1315_p13 }
  0x4e   : > { %p1313_p1 = pneg %p1312_p2 }
  0x4f   : > { %p1319_p5 = por %p1318_p3, %p1317_p10 }
  0x51   : > { %p1320_p9 = pnand %p1319_p5, %p1313_p1 }
  0x53   : > { %1323 = shalt.err (!%p1320_p9)
}
  0x54   : > { %s1324_s8 = scalar_lea.vmem %s1592_s17, 128  ;;  %s1417_s15 = smov [#allocation2]  }
  0x55   : > { %p1325_p12 = scmp.ne.s32.totalorder %s1592_s17, %s1324_s8  ;;  %s1329_s7 = sshll.u32 %s1417_s15, 4  ;;  %s1330_s7 = int_to_ptr.vmem [resolvable:$false] %s1329_s7 }
  0x56   : > { %s1331_s30 = scalar_lea.vmem %s1330_s7, 256  ;;  %p1332_p4 = scmp.lt.s32.totalorder %s1592_s17, %s1330_s7 }
  0x57   : > { %p1327_p2 = pnand %p1325_p12, %p1311_p0  ;;  %p1333_p13 = scmp.lt.s32.totalorder %s1331_s30, %s1324_s8 }
  0x59   : > { %p1328_p7 = pneg %p1327_p2  ;;  %p1334_p6 = por %p1333_p13, %p1332_p4 }
  0x5b   : > { %p1335_p10 = pnand %p1334_p6, %p1328_p7 }
  0x5d   : > { %1338 = shalt.err (!%p1335_p10)
}
  0x5e   : > { %1159 = dma.hbm_to_vmem [thread:$0]  (!%p1594_p11), %s1590_s16, 128, %s1592_s17, %s234_s19  }
  0x5f   : > { %254 = sbr.rel (%p1497_p8) target bundleno = 1234 (0x4d2), region = 44  ;;  %s1626_s20 = sand.u32 (!%p1497_p8), 1, %s1401_s22  }
  0x60   : > { %s1038_s9 = sshll.u32 (!%p1497_p8), %s1626_s20, 3  ;;  %s257_s13 = scalar_lea.sflag (!%p1497_p8), [#allocation3], %s1626_s20 }
  0x61   : > { %s260_s10 = scalar_lea.vmem (!%p1497_p8), [#allocation2], %s1038_s9  ;;  %p1738_p4 = scmp.ne.s32.totalorder (!%p1497_p8), %s1731_s27, 0 }
  0x66   : > { %1384 = dma.done.wait (%p1738_p4), %s257_s13, 128  }
  0x67   : > { %1386 = vsyncadd (%p1738_p4), %s257_s13, 4294967168  ;;  %p1739_p7 = scmp.eq.s32.totalorder %s1478_s25, 0 }
  0x69   : > { %1388 = dma.done.wait (%p1739_p7), [#allocation6], 4096   ;;  %p1740_p8 = pmov %p1739_p7 }
  0x6a   : > { %v1212_v0 = vld [vmem:[#allocation5 + $0x40] sm:$0xff]   ;;  %v1214_v2 = vld [vmem:[#allocation5 + $0x48] sm:$0xff]   ;;  %v1216_v4 = vld [vmem:[#allocation5 + $0x50] sm:$0xff]   ;;  %v1418_v20 = vmov 0.0   ;;  %vm1419_vm0 = vmmov 0   ;;  %vm547_vm1 = vcmask 1043456  }
  0x6b   : > { %1390 = vsyncadd (%p1740_p8), [#allocation6], 4294963200  ;;  %v1213_v1 = vld [vmem:[#allocation5] sm:$0xff]   ;;  %1087 = vmatprep.subr.bf16.mxu0 %v1212_v0  ;;  %v1215_v3 = vld [vmem:[#allocation5 + $0x8] sm:$0xff]   ;;  %1127 = vmatprep.subr.mxu1 %v1418_v20  ;;  %vm543_vm2 = vcmask 31744   ;;  %v1420_v50 = vmov 0  }
  0x6c   : > { %1088 = vmatpush3.bf16.msra.mxu0 %v1213_v1  ;;  %v1217_v5 = vld [vmem:[#allocation5 + $0x10] sm:$0xff]   ;;  %v1218_v6 = vld [vmem:[#allocation5 + $0x58] sm:$0xff]   ;;  %v1220_v8 = vld [vmem:[#allocation5 + $0x60] sm:$0xff]   ;;  %1129 = vmatprep.mubr.msk.f32.mxu1 %vm1419_vm0, %v1418_v20  ;;  %s1086_s14 = sshll.u32 %s1478_s25, 7  ;;  %s296_s8 = scalar_lea.vmem [#allocation8], %s1038_s9 }
  0x6d   : > { %1089 = vmatprep.subr.bf16.mxu0 %v1214_v2  ;;  %v1219_v7 = vld [vmem:[#allocation5 + $0x18] sm:$0xff]   ;;  %v1221_v9 = vld [vmem:[#allocation5 + $0x20] sm:$0xff]   ;;  %v1222_v10 = vld [vmem:[#allocation5 + $0x68] sm:$0xff]   ;;  %1211 = vset.pattern.permute.xlu0 %v1420_v50  ;;  %s940_s15 = sshll.u32 %s296_s8, 4  ;;  %s1677_s13 = scalar_lea.hbm %s1727_s6, %s1086_s14  ;;  %s1679_s15 = int_to_ptr.vmem [resolvable:$true] %s940_s15 }
  0x6e   : > { %v1640_v11 = vld [vmem:[%s260_s10] sm:$0xff]  ;;  %v1223_v12 = vld [vmem:[#allocation5 + $0x28] sm:$0xff]   ;;  %s926_s10 = scalar_lea.sflag [#allocation4], %s1626_s20  ;;  %s1339_s27 = scalar_lea.vmem %s1679_s15, 128 }
  0x6f   : > { %v1644_v13 = vcombine.high %v1640_v11, %v1640_v11  ;;  %v1224_v14 = vld [vmem:[#allocation5 + $0x70] sm:$0xff]   ;;  %v1226_v17 = vld [vmem:[#allocation5 + $0x78] sm:$0xff]   ;;  %v302_v19 = vpack.c.bf16 %v1640_v11, %v1640_v11  ;;  %v1231_v31 = vld [vmem:[#allocation7 + $0x4] ss:$8 sps:$4 sm:$0xff]   ;;  %p1340_p11 = scmp.ne.s32.totalorder %s1679_s15, %s1339_s27  ;;  %p1741_p0 = scmp.ne.s32.totalorder %s1736_s12, 0 }
  0x70   : > { %1090 = vmatpush3.bf16.msra.mxu0 %v1215_v3  ;;  %v1225_v16 = vld [vmem:[#allocation5 + $0x30] sm:$0xff]   ;;  %v1227_v18 = vld [vmem:[#allocation5 + $0x38] sm:$0xff]   ;;  %v1229_v33 = vld [vmem:[#allocation7] ss:$8 sps:$4 sm:$0xff]   ;;  %s1421_s25 = smov [#allocation8]  }
  0x71   : > { %1091 = vmatprep.subr.bf16.mxu0 %v1216_v4  ;;  %v303_v15 = vpack.c.bf16 %v1644_v13, %v1644_v13  ;;  %v542_v26 = vld [vmem:[%s1724_s3] sm:$0xf]  ;;  %v1234_v35 = vld [vmem:[#allocation7 + $0x14] ss:$8 sps:$4 sm:$0xff]   ;;  %v1237_v38 = vld [vmem:[#allocation7 + $0x24] ss:$8 sps:$4 sm:$0xff]   ;;  %p1341_p1 = pnand %p1340_p11, %p1741_p0 }
  0x72   : > { %v697_v32 = vld [vmem:[%s1725_s4] sm:$0xf]  ;;  %v1235_v39 = vld [vmem:[#allocation7 + $0x20] ss:$8 sps:$4 sm:$0xff]   ;;  %v1240_v40 = vld [vmem:[#allocation7 + $0x34] ss:$8 sps:$4 sm:$0xff]  }
  0x73   : > { %464 = vmatprep.mubr.bf16.mxu0 %v303_v15  ;;  %v1232_v37 = vld [vmem:[#allocation7 + $0x10] ss:$8 sps:$4 sm:$0xff]   ;;  %v1243_v42 = vld [vmem:[#allocation7 + $0x44] ss:$8 sps:$4 sm:$0xff]   ;;  %v1241_v43 = vld [vmem:[#allocation7 + $0x40] ss:$8 sps:$4 sm:$0xff]   ;;  %p1342_p3 = pneg %p1341_p1 }
  0x74   : > { %1092 = vmatpush3.bf16.msra.mxu0 %v1217_v5  ;;  %v1238_v41 = vld [vmem:[#allocation7 + $0x30] ss:$8 sps:$4 sm:$0xff]   ;;  %v1246_v44 = vld [vmem:[#allocation7 + $0x54] ss:$8 sps:$4 sm:$0xff]   ;;  %v1249_v46 = vld [vmem:[#allocation7 + $0x64] ss:$8 sps:$4 sm:$0xff]  }
  0x75   : > { %1093 = vmatprep.subr.bf16.mxu0 %v1218_v6  ;;  %v1244_v45 = vld [vmem:[#allocation7 + $0x50] ss:$8 sps:$4 sm:$0xff]   ;;  %v1247_v47 = vld [vmem:[#allocation7 + $0x60] ss:$8 sps:$4 sm:$0xff]   ;;  %v1252_v48 = vld [vmem:[#allocation7 + $0x74] ss:$8 sps:$4 sm:$0xff]  }
  0x76   : > { %v1250_v49 = vld [vmem:[#allocation7 + $0x70] ss:$8 sps:$4 sm:$0xff]   ;;  %s1343_s9 = sshll.u32 %s1421_s25, 4  ;;  %s1344_s9 = int_to_ptr.vmem [resolvable:$false] %s1343_s9 }
  0x77   : > { %v791_v51 = vld [vmem:[%s1726_s5] sm:$0xf]  ;;  %s1345_s29 = scalar_lea.vmem %s1344_s9, 256  ;;  %p1346_p5 = scmp.lt.s32.totalorder %s1679_s15, %s1344_s9 }
  0x78   : > { %1094 = vmatpush3.bf16.msra.mxu0 %v1219_v7  ;;  %794 = vperm.xlu0 %1211, %v791_v51   ;;  %p1347_p9 = scmp.lt.s32.totalorder %s1345_s29, %s1339_s27 }
  0x79   : > { %1095 = vmatprep.subr.bf16.mxu0 %v1220_v8 }
  0x7a   : > { %p1348_p12 = por %p1347_p9, %p1346_p5 }
  0x7c   : > { %1096 = vmatpush3.bf16.msra.mxu0 %v1221_v9  ;;  %p1349_p2 = pnand %p1348_p12, %p1342_p3 }
  0x7d   : > { %1097 = vmatprep.subr.bf16.mxu0 %v1222_v10 }
  0x80   : > { %1098 = vmatpush3.bf16.msra.mxu0 %v1223_v12 }
  0x81   : > { %1099 = vmatprep.subr.bf16.mxu0 %v1224_v14 }
  0x84   : > { %1100 = vmatpush3.bf16.msra.mxu0 %v1225_v16 }
  0x85   : > { %1101 = vmatprep.subr.bf16.mxu0 %v1226_v17 }
  0x88   : > { %1102 = vmatpush3.bf16.msra.mxu0 %v1227_v18 }
  0x89   : > { %1117 = vmatprep.subr.mxu0 %v1418_v20 }
  0x8b   : > { %465 = vmatmul.mubr.bf16.vlgmr.msra.gmra.mrb[0].mxu0 %v302_v19 }
  0x8c   : > { %1119 = vmatprep.mubr.msk.f32.mxu0 %vm1419_vm0, %v1418_v20 }
  0xf7   : > { %v795_v55 = vpop.permute.xlu0 %794 }
 0x15e   : > { %v1103_v21 = vpop.f32.mrb[0].mxu0 }
 0x15f   : > { %v1104_v22 = vpop.f32.mrb[1].mxu0 }
 0x160   : > { %v1105_v23 = vadd.f32 %v1104_v22, %v1103_v21  ;;  %v1106_v24 = vpop.f32.mrb[2].mxu0 }
 0x161   : > { %v1107_v25 = vpop.f32.mrb[3].mxu0 }
 0x162   : > { %1118 = vmatpush3.xpose.msra.mxu0 %v1105_v23 }
 0x163   : > { %1122 = vmatprep.subr.mxu0 %v1418_v20 }
 0x165   : > { %1120 = vmatmul.mubr.f32.vlgmr.msra.gmra.mrb[4].mxu0 %v1105_v23 }
 0x166   : > { %1123 = vmatpush3.msk.msra.mxu0 %vm547_vm1, %v1105_v23  ;;  %1124 = vmatprep.mubr.msk.f32.mxu0 %vm1419_vm0, %v1418_v20 }
 0x169   : > { %1125 = vmatmul.mubr.msk.f32.vlgmr.msra.gmra.mrb[6].mxu0 %vm543_vm2, %v542_v26 }
 0x238   : > { %v538_v27 = vpop.f32.mrb[4].mxu0 }
 0x239   : > { %v1121_v28 = vpop.f32.mrb[5].mxu0 }
 0x23c   : > { %v617_v29 = vpop.f32.mrb[6].mxu0 }
 0x23d   : > { %1128 = vmatpush3.msk.msra.mxu1 %vm547_vm1, %v617_v29  ;;  %v1126_v30 = vpop.f32.mrb[7].mxu0 }
 0x23e   : > { %1130 = vmatmul.mubr.msk.f32.vlgmr.msra.gmra.mrb[0].mxu1 %vm543_vm2, %v538_v27  ;;  %1132 = vmatprep.subr.mxu1 %v1418_v20 }
 0x23f   : > { %1134 = vmatprep.mubr.msk.f32.mxu1 %vm1419_vm0, %v1418_v20 }
 0x311   : > { %v693_v34 = vpop.f32.mrb[0].mxu1 }
 0x312   : > { %v1131_v36 = vpop.f32.mrb[1].mxu1  ;;  %1133 = vmatpush3.msk.msra.mxu1 %vm547_vm1, %v693_v34 }
 0x313   : > { %1135 = vmatmul.mubr.msk.f32.vlgmr.msra.gmra.mrb[2].mxu1 %vm543_vm2, %v697_v32  ;;  %877 = vmatprep.subr.bf16.mxu1 %v1231_v31 }
 0x314   : > { %878 = vmatpush1.bf16.msra.mxu1 %v1229_v33  ;;  %909 = vmatprep.mubr.bf16.mxu1 %v1420_v50 }
 0x315   : > { %879 = vmatprep.subr.bf16.mxu1 %v1234_v35 }
 0x318   : > { %880 = vmatpush1.bf16.msra.mxu1 %v1232_v37 }
 0x319   : > { %881 = vmatprep.subr.bf16.mxu1 %v1237_v38 }
 0x31c   : > { %882 = vmatpush1.bf16.msra.mxu1 %v1235_v39 }
 0x31d   : > { %883 = vmatprep.subr.bf16.mxu1 %v1240_v40 }
 0x320   : > { %884 = vmatpush1.bf16.msra.mxu1 %v1238_v41 }
 0x321   : > { %885 = vmatprep.subr.bf16.mxu1 %v1243_v42 }
 0x324   : > { %886 = vmatpush1.bf16.msra.mxu1 %v1241_v43 }
 0x325   : > { %887 = vmatprep.subr.bf16.mxu1 %v1246_v44 }
 0x328   : > { %888 = vmatpush1.bf16.msra.mxu1 %v1244_v45 }
 0x329   : > { %889 = vmatprep.subr.bf16.mxu1 %v1249_v46 }
 0x32c   : > { %890 = vmatpush1.bf16.msra.mxu1 %v1247_v47 }
 0x32d   : > { %891 = vmatprep.subr.bf16.mxu1 %v1252_v48 }
 0x330   : > { %892 = vmatpush1.bf16.msra.mxu1 %v1250_v49 }
 0x3e6   : > { %v770_v52 = vpop.f32.mrb[2].mxu1 }
 0x3e7   : > { %v774_v53 = vpack.c.bf16 %v770_v52, %v770_v52  ;;  %v1136_v54 = vpop.f32.mrb[3].mxu1 }
 0x3e9   : > { %910 = vmatmul.mubr.bf16.vlgmr.msra.gmra.mrb[4].mxu1 %v774_v53 }
 0x4bc   : > { %v911_v56 = vpop.f32.mrb[4].mxu1 }
 0x4bd   : > { %v913_v57 = vpop.f32.mrb[5].mxu1  ;;  %v912_v58 = vadd.f32 %v911_v56, %v795_v55 }
 0x4be   : > { %v915_v59 = vpop.f32.mrb[6].mxu1  ;;  %v914_v60 = vadd.f32 %v913_v57, %v795_v55 }
 0x4bf   : > { %v918_v61 = vadd.f32 %v912_v58, %v1640_v11  ;;  %v916_v62 = vpop.f32.mrb[7].mxu1 }
 0x4c0   : > { %v919_v63 = vadd.f32 %v914_v60, %v1644_v13 }
 0x4c2   : > { %v922_v0 = vcombine.low %v918_v61, %v919_v63 }
 0x4c4   : > { %924 = vst [vmem:[%s296_s8] sm:$0xff] %v922_v0 }
 0x4c5   : > { %1352 = shalt.err (!%p1349_p2)
}
 0x4c6   : > { %s1353_s20 = scalar_lea.hbm %s1677_s13, 128  ;;  %s1357_s18 = scalar_lea.hbm %s1727_s6, 256 }
 0x4c7   : > { %p1354_p13 = scmp.ne.s32.totalorder %s1677_s13, %s1353_s20  ;;  %p1358_p4 = scmp.lt.u32.totalorder %s1677_s13, %s1727_s6 }
 0x4c8   : > { %p1359_p7 = scmp.lt.u32.totalorder %s1357_s18, %s1353_s20  ;;  %p1361_p11 = scmp.lt.u32.totalorder %s1353_s20, %s1677_s13 }
 0x4c9   : > { %p1355_p6 = pnand %p1354_p13, %p1741_p0 }
 0x4ca   : > { %p1360_p8 = por %p1359_p7, %p1358_p4 }
 0x4cb   : > { %p1356_p10 = pneg %p1355_p6 }
 0x4cc   : > { %p1362_p1 = por %p1361_p11, %p1360_p8 }
 0x4ce   : > { %p1363_p3 = pnand %p1362_p1, %p1356_p10 }
 0x4d0   : > { %1366 = shalt.err (!%p1363_p3)
}
 0x4d1   : > { %1147 = dma.vmem_to_hbm [thread:$0]  (%p1741_p0), %s1679_s15, 128, %s1677_s13, %s926_s10  }
 0x4d2 PF: > { %s952_s8 = sand.u32 1, %s1397_s21   ;;  %p1742_p5 = scmp.ne.s32.totalorder %s1732_s28, 0 }
 0x4d3   : > { %p1743_p9 = scmp.ge.s32.totalorder %s1409_s24, 2  ;;  %s953_s7 = scalar_lea.sflag [#allocation4], %s952_s8 }
 0x4d5   : > { %p1161_p12 = pnand %p1743_p9, %p1742_p5 }
 0x4d7   : > { %1392 = dma.done.wait (!%p1161_p12), %s953_s7, 128  }
 0x4d8   : > { %1394 = vsyncadd (!%p1161_p12), %s953_s7, 4294967168  ;;  %p20_p2 = scmp.ge.s32.totalorder %s1567_s26, 4   ;;  %s1744_s21 = smov %s1401_s22 }
 0x4d9   : > { %s1745_s22 = smov %s1405_s23  ;;  %s1746_s23 = smov %s1576_s11 }
 0x4da   : > { %s1747_s24 = smov %s1567_s26  ;;  %22 = sbr.rel (!%p20_p2) target bundleno = 6 (0x6), region = 97 }
 0x4e1   :  { %958 = vsyncpa [#allocation3], 1 }
 0x4e2   :  { %960 = vsyncpa [#allocation3 + $0x1], 1 }
 0x4e3   :  { %961 = vsyncpa [#allocation6], 1 }
 0x4e4   :  { %962 = vsyncpa [#allocation4], 1 }
 0x4e5   :  { %964 = vsyncpa [#allocation4 + $0x1], 1 }

</bundles_post_ra>
